<compile_context>
chip_gen: v7x
topology: tpu7x:2x2x1
jax: 0.10.0
libtpu: 0.0.40
codegen_flags: <defaults>
</compile_context>

<pallas_src>
import functools

import jax
import jax.numpy as jnp
from jax.experimental import pallas as pl
from jax.experimental.pallas import tpu as pltpu


def _round_up(x, m):
    return (x + m - 1) // m * m


@functools.lru_cache(maxsize=1)
def _vmem_limit_bytes():
    """Per-generation VMEM limit: ~85% of physical, capped at 110 MiB.

    v5e / v6e (128 MiB physical) -> ~110 MiB;  v7x (64 MiB per TC) -> ~54 MiB.
    Fallback when the query fails -> ~54 MiB (safe on every generation).
    """
    phys = None
    try:
        info = pltpu.get_tpu_info()
        for attr in ("vmem_capacity_bytes", "vmem_size_bytes", "vmem_bytes"):
            v = getattr(info, attr, None)
            if v:
                phys = int(v)
                break
    except Exception:
        phys = None
    if not phys:
        phys = 64 * 1024 * 1024
    return min(int(phys * 0.85), 110 * 1024 * 1024)


def _pick_tiles(B, n_in, n_out, T, x_itemsize, budget_bytes):
    """Choose (batch_tile, time_tile) under TPU tiling rules + a VMEM budget.

    Time tile: prefer the whole time axis in one lane-dense block (no tail
    masking, single reduction step); otherwise 256-multiples (full MXU lane
    width on v6e/v7x) with a masked tail; 128 as a last resort.
    Batch tile: largest of {16,8,4,2,1} that keeps >=2 blocks on the parallel
    batch axis (v7x has 2 TensorCores) and fits the budget.
    """
    n_in_p8 = _round_up(n_in, 8)
    n_in_p128 = _round_up(n_in, 128)
    n_out_p8 = _round_up(n_out, 8)

    def step_bytes(tb, tt):
        tt_p = _round_up(tt, 128)
        x_b = 2 * tb * n_in_p8 * tt_p * x_itemsize      # double-buffered x block
        w_b = 2 * n_out_p8 * n_in_p128 * x_itemsize     # resident weight (2 bufs)
        bias_b = 2 * n_out_p8 * 128 * 4                 # resident bias
        tmp_b = 3 * n_out_p8 * tt_p * 4                 # logits/sigmoid f32 temps
        acc_b = n_out_p8 * 128 * 4                      # f32 accumulator scratch
        out_b = 2 * n_out_p8 * 128 * 4                  # output slab (2 bufs)
        return x_b + w_b + bias_b + tmp_b + acc_b + out_b

    tt_cands = []
    if T <= 4096:
        tt_cands.append(T)                              # exact: no tail masking
    tt_cands += [tt for tt in (2048, 1792, 1536, 1280, 1024, 768, 512, 256, 128)
                 if tt < T]
    tb_cands = [tb for tb in (16, 8, 4, 2, 1) if 2 * tb <= B] or [1]

    for tt in tt_cands:                                 # largest time tile first
        for tb in tb_cands:                             # then largest batch tile
            if step_bytes(tb, tt) <= budget_bytes:
                return tb, tt
    return 1, min(128, tt_cands[-1])                    # most conservative tiles


def _mean_pool_kernel(x_ref, w_ref, b_ref, o_ref, acc_ref, *,
                      inv_t, t_total, t_tile):
    """One (batch-block, time-block) grid step.

    x_ref:   (TB, n_in, TT)   input slab; lanes = time (dense HBM loads)
    w_ref:   (n_out, n_in)    1x1-conv weight (PyTorch layout), VMEM-resident
    b_ref:   (n_out, 1)       bias column, f32
    o_ref:   (1, n_out, TB)   f32 output slab for this batch block
    acc_ref: (n_out, TB)      f32 running sum of sigmoid(logits) over time
    """
    ti = pl.program_id(1)

    @pl.when(ti == 0)
    def _init():
        acc_ref[...] = jnp.zeros_like(acc_ref)

    w = w_ref[...]
    bias = b_ref[...]
    tb = acc_ref.shape[1]

    # Lane mask for a padded tail time block (T not a multiple of TT).
    needs_mask = (t_total % t_tile) != 0
    if needs_mask:
        t0 = ti * t_tile
        t_idx = t0 + jax.lax.broadcasted_iota(jnp.int32, (1, t_tile), 1)
        mask = t_idx < t_total                           # (1, TT)

    # Static unroll over the batch block; each iteration is one MXU matmul
    # (M=n_out, K=n_in, N=TT) + VPU bias add + EUP sigmoid + XLU lane-sum.
    # Per-column accumulation into the scratch (static b) avoids the old
    # jnp.concatenate lane shuffle and bounds live ranges per iteration.
    for b in range(tb):
        logits = jnp.dot(w, x_ref[b],
                         preferred_element_type=jnp.float32)   # (n_out, TT) f32
        cla = jax.nn.sigmoid(logits + bias)                    # (n_out, TT) f32
        if needs_mask:
            cla = jnp.where(mask, cla, 0.0)
        acc_ref[:, b:b + 1] += jnp.sum(cla, axis=-1, keepdims=True)

    @pl.when(ti == pl.num_programs(1) - 1)
    def _finalize():
        o_ref[0] = (acc_ref[...] * inv_t).astype(o_ref.dtype)


@jax.jit
def mean_pooling_forward(x_nchw, weight, bias):
    """x_nchw: (B, n_in, T, 1); weight: (n_out, n_in[,1,1]); bias: (n_out,)."""
    B, n_in, T, _ = x_nchw.shape
    n_out = weight.shape[0]

    # Free layout glue only: squeeze W=1 (keeps memory order, T stays minor /
    # lane-dense) -- no transpose of x.  Weight used in native (n_out, n_in)
    # layout; bias becomes an f32 column.
    x = x_nchw[:, :, :, 0]                                   # (B, n_in, T)
    w = weight.reshape(n_out, n_in).astype(x.dtype)          # (n_out, n_in)
    b_col = bias.reshape(n_out, 1).astype(jnp.float32)       # (n_out, 1)

    vmem_limit = _vmem_limit_bytes()
    budget = int(vmem_limit * 0.65)
    tb, tt = _pick_tiles(B, n_in, n_out, T, x.dtype.itemsize, budget)
    nb = pl.cdiv(B, tb)
    nt = pl.cdiv(T, tt)

    out3 = pl.pallas_call(
        functools.partial(_mean_pool_kernel,
                          inv_t=1.0 / T, t_total=T, t_tile=tt),
        out_shape=jax.ShapeDtypeStruct((nb, n_out, tb), jnp.float32),
        grid_spec=pltpu.PrefetchScalarGridSpec(
            num_scalar_prefetch=0,
            grid=(nb, nt),
            in_specs=[
                pl.BlockSpec((tb, n_in, tt), lambda bi, ti: (bi, 0, ti)),
                pl.BlockSpec((n_out, n_in), lambda bi, ti: (0, 0)),   # resident
                pl.BlockSpec((n_out, 1), lambda bi, ti: (0, 0)),      # resident
            ],
            out_specs=pl.BlockSpec((1, n_out, tb), lambda bi, ti: (bi, 0, 0)),
            scratch_shapes=[pltpu.VMEM((n_out, tb), jnp.float32)],
        ),
        compiler_params=pltpu.CompilerParams(
            dimension_semantics=("parallel", "arbitrary"),
            vmem_limit_bytes=int(vmem_limit),
        ),
    )(x, w, b_col)

    # Tiny (B*n_out elements) layout fix-up outside the kernel:
    # (nb, n_out, TB) -> (B, n_out), f32.
    out = jnp.transpose(out3, (0, 2, 1)).reshape(nb * tb, n_out)[:B]
    return out, []


def init_params(key, n_in, n_out, dtype=jnp.float32):
    # Mirrors init_layer for the 1x1 conv: n = n_in * 1 * 1.
    n = n_in * 1 * 1
    std = (2.0 / n) ** 0.5
    scale = std * (3.0 ** 0.5)
    weight = jax.random.uniform(key, (n_out, n_in, 1, 1), dtype=dtype,
                                minval=-scale, maxval=scale)
    bias = jnp.zeros((n_out,), dtype=dtype)
    return weight, bias


def _reference(x, weight, bias):
    n_out, n_in = weight.shape[0], weight.shape[1]
    w2 = weight.reshape(n_out, n_in)
    return jnp.mean(
        jax.nn.sigmoid(
            jnp.einsum("oc,bct->bot", w2, x[:, :, :, 0],
                       precision=jax.lax.Precision.HIGHEST)
            + bias[None, :, None]),
        axis=2)


if __name__ == "__main__":
    key = jax.random.PRNGKey(0)
    k_x, k_w, k_b, k_x2 = jax.random.split(key, 4)

    B, n_in, T, n_out = 2, 4, 16, 8
    x = jax.random.normal(k_x, (B, n_in, T, 1), dtype=jnp.float32)
    weight, bias = init_params(k_w, n_in, n_out)
    # init_layer zeroes the bias; use a small random bias to exercise that path.
    bias = 0.1 * jax.random.normal(k_b, (n_out,), dtype=jnp.float32)

    out, aux = mean_pooling_forward(x, weight, bias)
    out = jax.block_until_ready(out)
    ref = _reference(x, weight, bias)

    assert out.shape == (B, n_out)
    assert out.dtype == jnp.float32
    assert aux == []
    assert jnp.allclose(out, ref, atol=1e-3, rtol=1e-3), \
        float(jnp.max(jnp.abs(out - ref)))

    # Masked-tail path: T > one time tile and not a multiple of the tile.
    T2 = 4097
    x2 = jax.random.normal(k_x2, (B, n_in, T2, 1), dtype=jnp.float32)
    out2, _ = mean_pooling_forward(x2, weight, bias)
    out2 = jax.block_until_ready(out2)
    ref2 = _reference(x2, weight, bias)
    assert jnp.allclose(out2, ref2, atol=1e-3, rtol=1e-3), \
        float(jnp.max(jnp.abs(out2 - ref2)))

    # bf16 inputs halve HBM bytes of the dominant x stream (memory-bound op);
    # accumulation / bias / sigmoid / 1/T stay f32 and the result stays f32.
    out_bf16, _ = mean_pooling_forward(x.astype(jnp.bfloat16),
                                       weight.astype(jnp.bfloat16), bias)
    out_bf16 = jax.block_until_ready(out_bf16)
    assert out_bf16.dtype == jnp.float32
    assert jnp.allclose(out_bf16, ref, atol=2e-2, rtol=2e-2)

    print("KERNEL_OK")
</pallas_src>

<mosaic_0001>
module attributes {stable_mosaic.version = 11 : i64} {
  func.func @_mean_pool_kernel(%arg0: i32, %arg1: i32, %arg2: memref<1x4x16xf32, #tpu.memory_space<vmem>>, %arg3: memref<8x4xf32, #tpu.memory_space<vmem>>, %arg4: memref<8x1xf32, #tpu.memory_space<vmem>>, %arg5: memref<1x8x1xf32, #tpu.memory_space<vmem>>, %arg6: memref<8x1xf32, #tpu.memory_space<vmem>>) attributes {dimension_semantics = [#tpu.dimension_semantics<parallel>, #tpu.dimension_semantics<arbitrary>], iteration_bounds = array<i64: 2, 1>, scalar_prefetch = 0 : i64, scratch_operands = 1 : i64, tpu.core_type = #tpu.core_type<tc>, window_params = [{transform_indices = @transform_0, window_bounds = array<i64: 1, 4, 16>}, {pipeline_mode = #tpu.pipeline_mode<synchronous>, transform_indices = @transform_1, window_bounds = array<i64: 8, 4>}, {pipeline_mode = #tpu.pipeline_mode<synchronous>, transform_indices = @transform_2, window_bounds = array<i64: 8, 1>}, {transform_indices = @transform_3, window_bounds = array<i64: 1, 8, 1>}]} {
    %c0_i32 = arith.constant 0 : i32
    %0 = arith.cmpi eq, %arg1, %c0_i32 : i32
    %1 = arith.extui %0 : i1 to i32
    %c0_i32_0 = arith.constant 0 : i32
    %2 = arith.cmpi ne, %1, %c0_i32_0 : i32
    scf.if %2 {
      %cst_15 = arith.constant 0.000000e+00 : f32
      %23 = vector.broadcast %cst_15 : f32 to vector<8x1xf32>
      %c0_16 = arith.constant 0 : index
      %c0_17 = arith.constant 0 : index
      %24 = vector.load %arg6[%c0_16, %c0_17] : memref<8x1xf32, #tpu.memory_space<vmem>>, vector<8x1xf32>
      tpu.vector_store %arg6[%c0_16, %c0_17], %23 {strides = array<i32>} : memref<8x1xf32, #tpu.memory_space<vmem>>, vector<8x1xf32>,
    } else {
    }
    %c0 = arith.constant 0 : index
    %c0_1 = arith.constant 0 : index
    %3 = vector.load %arg3[%c0, %c0_1] : memref<8x4xf32, #tpu.memory_space<vmem>>, vector<8x4xf32>
    %c0_2 = arith.constant 0 : index
    %c0_3 = arith.constant 0 : index
    %4 = vector.load %arg4[%c0_2, %c0_3] : memref<8x1xf32, #tpu.memory_space<vmem>>, vector<8x1xf32>
    %c0_4 = arith.constant 0 : index
    %c0_5 = arith.constant 0 : index
    %c0_6 = arith.constant 0 : index
    %5 = vector.load %arg2[%c0_4, %c0_5, %c0_6] : memref<1x4x16xf32, #tpu.memory_space<vmem>>, vector<1x4x16xf32>
    %6 = vector.shape_cast %5 : vector<1x4x16xf32> to vector<4x16xf32>
    %cst = arith.constant dense<0.000000e+00> : vector<8x16xf32>
    %7 = tpu.matmul %3, %6, %cst {dimension_numbers = #tpu.dot_dimension_numbers<[1], [0], [0], [1], [0, 0, 1, 1], [], []>} : vector<8x4xf32>, vector<4x16xf32>, vector<8x16xf32> -> vector<8x16xf32>
    %8 = vector.broadcast %4 : vector<8x1xf32> to vector<8x16xf32>
    %9 = arith.addf %7, %8 : vector<8x16xf32>
    %10 = arith.negf %9 : vector<8x16xf32>
    %11 = math.exp %10 : vector<8x16xf32>
    %cst_7 = arith.constant 1.000000e+00 : f32
    %12 = vector.broadcast %cst_7 : f32 to vector<8x16xf32>
    %13 = arith.addf %12, %11 : vector<8x16xf32>
    %14 = arith.divf %12, %13 : vector<8x16xf32>
    %c0_8 = arith.constant 0 : index
    %c0_9 = arith.constant 0 : index
    %15 = vector.load %arg6[%c0_8, %c0_9] : memref<8x1xf32, #tpu.memory_space<vmem>>, vector<8x1xf32>
    %cst_10 = arith.constant dense<0.000000e+00> : vector<8xf32>
    %16 = vector.multi_reduction <add>, %14, %cst_10 [1] : vector<8x16xf32> to vector<8xf32>
    %17 = vector.shape_cast %16 : vector<8xf32> to vector<8x1xf32>
    %18 = arith.addf %15, %17 : vector<8x1xf32>
    %c0_11 = arith.constant 0 : index
    %c0_12 = arith.constant 0 : index
    %19 = vector.load %arg6[%c0_11, %c0_12] : memref<8x1xf32, #tpu.memory_space<vmem>>, vector<8x1xf32>
    tpu.vector_store %arg6[%c0_11, %c0_12], %18 {strides = array<i32>} : memref<8x1xf32, #tpu.memory_space<vmem>>, vector<8x1xf32>,
    %c0_i32_13 = arith.constant 0 : i32
    %20 = arith.cmpi eq, %arg1, %c0_i32_13 : i32
    %21 = arith.extui %20 : i1 to i32
    %c0_i32_14 = arith.constant 0 : i32
    %22 = arith.cmpi ne, %21, %c0_i32_14 : i32
    scf.if %22 {
      %c0_15 = arith.constant 0 : index
      %c0_16 = arith.constant 0 : index
      %23 = vector.load %arg6[%c0_15, %c0_16] : memref<8x1xf32, #tpu.memory_space<vmem>>, vector<8x1xf32>
      %cst_17 = arith.constant 6.250000e-02 : f32
      %24 = vector.broadcast %cst_17 : f32 to vector<8x1xf32>
      %25 = arith.mulf %23, %24 : vector<8x1xf32>
      %c0_18 = arith.constant 0 : index
      %c0_19 = arith.constant 0 : index
      %c0_20 = arith.constant 0 : index
      %26 = vector.load %arg5[%c0_18, %c0_19, %c0_20] : memref<1x8x1xf32, #tpu.memory_space<vmem>>, vector<1x8x1xf32>
      %27 = vector.shape_cast %26 : vector<1x8x1xf32> to vector<8x1xf32>
      %28 = vector.shape_cast %25 : vector<8x1xf32> to vector<1x8x1xf32>
      tpu.vector_store %arg5[%c0_18, %c0_19, %c0_20], %28 {strides = array<i32>} : memref<1x8x1xf32, #tpu.memory_space<vmem>>, vector<1x8x1xf32>,
    } else {
    }
    return
  }
  func.func @transform_0(%arg0: i32, %arg1: i32) -> (i32, i32, i32) {
    %c0_i32 = arith.constant 0 : i32
    %c0_i32_0 = arith.constant 0 : i32
    return %arg0, %c0_i32, %arg1 : i32, i32, i32
  }
  func.func @transform_1(%arg0: i32, %arg1: i32) -> (i32, i32) {
    %c0_i32 = arith.constant 0 : i32
    %c0_i32_0 = arith.constant 0 : i32
    %c0_i32_1 = arith.constant 0 : i32
    return %c0_i32, %c0_i32_0 : i32, i32
  }
  func.func @transform_2(%arg0: i32, %arg1: i32) -> (i32, i32) {
    %c0_i32 = arith.constant 0 : i32
    %c0_i32_0 = arith.constant 0 : i32
    %c0_i32_1 = arith.constant 0 : i32
    return %c0_i32, %c0_i32_0 : i32, i32
  }
  func.func @transform_3(%arg0: i32, %arg1: i32) -> (i32, i32, i32) {
    %c0_i32 = arith.constant 0 : i32
    %c0_i32_0 = arith.constant 0 : i32
    %c0_i32_1 = arith.constant 0 : i32
    return %arg0, %c0_i32, %c0_i32_0 : i32, i32, i32
  }
}

</mosaic_0001>

<bundles_post_ra>
// kernel: mean_pooling_forward.1
= control target key start
LH: loop header
LB: loop body
LE: loop exit
PB: predicated region body
PF: predicated region fallthrough
CT: control target
= control target key end

     0   :  { %s463_s12 = smov 0   ;;  %s465_s13 = smov 0   ;;  %s509_s0 = inlined_call_operand.vmem [shape: f32[2,4,16], index: 0, kind: input, shape index: {}]   ;;  %s510_s1 = inlined_call_operand.vmem [shape: f32[8,4], index: 1, kind: input, shape index: {}]   ;;  %s511_s2 = inlined_call_operand.vmem [shape: f32[8,1], index: 2, kind: input, shape index: {}]   ;;  %s512_s3 = inlined_call_operand.vmem [shape: f32[2,8,1], index: 3, kind: output, shape index: {}]  }
   0x1   :  { %s467_s14 = smov 0  }
   0x2 LB: > { %s25_s15 = sadd.s32 1, %s434_s13  ;;  %p369_p0 = scmp.ge.s32.totalorder %s438_s14, 1  ;;  %s438_s14 = sphi %s467_s14, %s13_s14   ;;  %s434_s13 = sphi %s465_s13, %s514_s13   ;;  %s430_s12 = sphi %s463_s12, %s513_s12  }
   0x3   : > { %p27_p1 = scmp.ge.s32.totalorder %s25_s15, 2  ;;  %p153_p2 = scmp.lt.s32.totalorder %s438_s14, 3 }
   0x5   : > { %s516_s15 = smov (%p27_p1, %s25_s15), 0  ;;  %p154_p3 = pnand %p369_p0, %p153_p2 }
   0x6   : > { %vm193_vm0 = vcmask (!%p154_p3), 7168   ;;  %p178_p4 = scmp.lt.s32.totalorder (!%p154_p3), %s430_s12, 1  ;;  %v440_v0 = vmov (!%p154_p3), 0.0   ;;  %vm441_vm1 = vmmov (!%p154_p3), 0   ;;  %v196_v1 = vld [vmem:[%s511_s2] sm:$0xff] (!%p154_p3)  ;;  %v442_v2 = vmov (!%p154_p3), 0  }
   0x7   : > { %157 = sbr.rel (%p154_p3) target bundleno = 415 (0x19f), region = 32  ;;  %194 = vst.msk [vmem:[#allocation2] sm:$0xff] (!%p154_p3), %vm193_vm0, %v440_v0  ;;  %379 = vmatprep.subr.mxu0 (!%p154_p3), %v440_v0  ;;  %381 = vmatprep.mubr.msk.f32.mxu0 (!%p154_p3), %vm441_vm1, %v440_v0  ;;  %vm207_vm2 = vcmask (!%p154_p3), 1043456   ;;  %v195_v3 = vld [vmem:[%s510_s1] sm:$0xff] (!%p154_p3)  ;;  %vm203_vm3 = vcmask (!%p154_p3), 31744   ;;  %vm288_vm4 = vcmask (!%p154_p3), 130048  }
   0x8   : > { %411 = vset.pattern.permute.xlu0 (!%p154_p3), %v442_v2 }
   0x9   : > { %200 = vperm.xlu0 (!%p154_p3), %411, %v196_v1  }
   0xe   : > { %s518_s12 = smov (!%p178_p4, %s430_s12), 1  ;;  %v287_v14 = vld [vmem:[#allocation2] sm:$0xff] }
   0xf   : > { %s370_s18 = sshll.u32 %s518_s12, 2  ;;  %s371_s24 = sshll.u32 %s518_s12, 3 }
  0x10   : > { %s184_s21 = scalar_lea.vmem %s509_s0, %s370_s18  ;;  %s188_s27 = scalar_lea.vmem %s512_s3, %s371_s24 }
  0x11   : > { %v197_v4 = vld [vmem:[%s184_s21] sm:$0xf] }
  0x12   : > { %380 = vmatpush3.msk.msra.mxu0 %vm207_vm2, %v197_v4 }
  0x13   : > { %382 = vmatmul.mubr.msk.f32.vlgmr.msra.gmra.mrb[0].mxu0 %vm203_vm3, %v195_v3 }
  0x88   : > { %v201_v5 = vpop.permute.xlu0 %200 }
  0xe6   : > { %v277_v6 = vpop.f32.mrb[0].mxu0 }
  0xe7   : > { %v278_v7 = vadd.f32 %v277_v6, %v201_v5  ;;  %v383_v8 = vpop.f32.mrb[1].mxu0 }
  0xe9   : > { %v374_v9 = vmul.f32 -1.442695, %v278_v7 }
  0xeb   : > { %412 = vpow2.f32 %v374_v9 }
  0xf5   : > { %v413_v10 = vpop.eup %412 }
  0xf6   : > { %v284_v11 = vadd.f32 1.0, %v413_v10 }
  0xf8   : > { %414 = vrcp.f32 %v284_v11 }
 0x102   : > { %v415_v12 = vpop.eup %414 }
 0x103   : > { %v289_v13 = vsel %vm288_vm4, %v415_v12, 0.0 }
 0x104   : > { %290 = vadd.xlane.f32.xlu0 %v289_v13 }
 0x191   : > { %v291_v15 = vpop.xlane.xlu0 %290 }
 0x192   : > { %v292_v16 = vadd.f32 %v291_v15, %v287_v14 }
 0x194   : > { %294 = vst.msk [vmem:[#allocation2] sm:$0xff] %vm193_vm0, %v292_v16 }
 0x19b   : > { %v298_v17 = vld [vmem:[#allocation2] sm:$0xff] }
 0x19c   : > { %v299_v18 = vmul.f32 0.0625, %v298_v17 }
 0x19e   : > { %300 = vst.msk [vmem:[%s188_s27] sm:$0xff] %vm193_vm0, %v299_v18 }
 0x19f PF: > { %s13_s14 = sadd.s32 1, %s438_s14   ;;  %s513_s12 = smov %s434_s13 }
 0x1a0   : > { %p10_p5 = scmp.ge.s32.totalorder %s13_s14, 4   ;;  %s514_s13 = smov %s516_s15 }
 0x1a2   :  { %12 = sbr.rel (!%p10_p5) target bundleno = 2 (0x2), region = 70 }

</bundles_post_ra>
